<compile_context>
chip_gen: v6e
topology: v6e:2x2x1
jax: 0.10.0
libtpu: 0.0.40
codegen_flags: <defaults>
</compile_context>

<pallas_src>
import numpy as np
import jax
import jax.numpy as jnp
from jax import lax
from jax.experimental import pallas as pl
from jax.experimental.pallas import tpu as pltpu

LANE = 128
SUBLANE = 8


def _round_up(x, m):
    return (x + m - 1) // m * m


def _tpu_vmem_and_cores():
    """Best-effort hardware query; conservative fallback (64 MiB = v7x VMEM)."""
    vmem_cap = 64 * 2**20
    n_cores = 1
    try:
        info = pltpu.get_tpu_info()
        vmem_cap = int(getattr(info, "vmem_capacity_bytes", vmem_cap))
        for attr in ("num_cores", "num_tensorcores", "tensorcores_per_chip",
                     "cores_per_chip"):
            v = getattr(info, attr, None)
            if v:
                n_cores = int(v)
                break
    except Exception:
        pass
    return vmem_cap, n_cores


def _per_image_vmem_bytes(Hp, Wp, Cin, Cout, Cp, mm_bytes):
    """Rough peak-live VMEM bytes per image inside one grid step."""
    Wpp = _round_up(Wp, SUBLANE)
    S1 = Hp * Wpp
    R1 = (Hp - 2) * Wpp
    R2 = (Hp - 4) * Wpp
    b = Hp * 2 * Wp * 2 * Cin * 4 * 2           # input block (double buffered)
    b += S1 * Cin * 4                            # pooled / flat1 (f32)
    b += S1 * 3 * Cin * (4 + mm_bytes)           # wide1 (f32 rolls + mm-dtype copy)
    b += R1 * Cout * 4 * 2                       # acc1 + y1
    b += R1 * 3 * Cout * (4 + mm_bytes)          # wide2
    b += R2 * Cp * 4 * 2                         # acc2 / y2
    b += R2 * Cp * 4 * 2                         # output block (double buffered)
    return b


def _pick_nb(n, max_nb, prefer_even_steps):
    """Images per grid step: largest divisor of n within the VMEM budget.
    On 2-TensorCore chips prefer an even number of grid steps so the parallel
    batch axis shards evenly (on 1-core chips just maximize NB)."""
    max_nb = max(1, min(n, max_nb))
    divs = [d for d in range(1, max_nb + 1) if n % d == 0]
    if prefer_even_steps:
        even = [d for d in divs if (n // d) % 2 == 0]
        if even:
            return max(even)
    return max(divs)


def make_downsample_kernel(NB, Hp, Wp, Cin, Cout, Cp, matmul_dtype, precision):
    H1, W1 = Hp - 2, Wp - 2          # spatial after conv1 (valid)
    H2, W2 = H1 - 2, W1 - 2          # spatial after conv2 (valid)
    Wpp = _round_up(Wp, SUBLANE)     # sublane-aligned flattened row stride
    S1 = Hp * Wpp                    # pooled rows per image (incl. junk cols)
    R1 = H1 * Wpp                    # conv1 rows per image
    R2 = H2 * Wpp                    # conv2 rows per image

    def kw_widen(a2d, rows):
        # a2d: (NB*rows, C).  Returns (NB*rows, 3*C) whose lane blocks are the
        # kw=0,1,2 shifted views of a2d.  The shift is a sublane rotation on
        # the XLU (pltpu.roll); its wraparound only feeds junk rows/columns.
        total = NB * rows
        pieces = [a2d]
        for kw in (1, 2):
            pieces.append(pltpu.roll(a2d, shift=total - kw, axis=0))
        return jnp.concatenate(pieces, axis=-1)

    def kernel(x_ref, w1_ref, s1_ref, b1_ref, w2_ref, s2_ref, b2_ref, o_ref):
        # ---- MaxPool2d(kernel_size=2, stride=2) ---------------------------
        x = x_ref[...].astype(jnp.float32)                # (NB, Hp, 2, Wp, 2*Cin)
        m = jnp.maximum(x[:, :, 0], x[:, :, 1])           # reduce dh -> (NB,Hp,Wp,2*Cin)
        pooled = jnp.maximum(m[..., :Cin], m[..., Cin:])  # reduce dw -> (NB,Hp,Wp,Cin)

        # Flatten (h, w) -> row = h*Wpp + w (Wpp is sublane-aligned).
        if Wpp != Wp:
            pooled = jnp.concatenate(
                [pooled, jnp.zeros((NB, Hp, Wpp - Wp, Cin), jnp.float32)], axis=2)
        flat1 = pooled.reshape(NB * S1, Cin)

        # ---- Conv1 (3x3 valid): 3 accumulating matmuls, K = 3*Cin ---------
        wide1 = kw_widen(flat1, S1).astype(matmul_dtype).reshape(NB, S1, 3 * Cin)
        acc1 = jnp.zeros((NB * R1, Cout), jnp.float32)
        for kh in range(3):
            lhs = wide1[:, kh * Wpp: kh * Wpp + R1, :].reshape(NB * R1, 3 * Cin)
            acc1 = acc1 + jnp.dot(lhs, w1_ref[kh],
                                  preferred_element_type=jnp.float32,
                                  precision=precision)
        # folded eval-mode BatchNorm affine + ReLU (f32)
        y1 = jnp.maximum(acc1 * s1_ref[...] + b1_ref[...], 0.0)   # (NB*R1, Cout)

        # ---- Conv2 (3x3 valid): 3 accumulating matmuls, K = 3*Cout --------
        wide2 = kw_widen(y1, R1).astype(matmul_dtype).reshape(NB, R1, 3 * Cout)
        acc2 = jnp.zeros((NB * R2, Cp), jnp.float32)
        for kh in range(3):
            lhs = wide2[:, kh * Wpp: kh * Wpp + R2, :].reshape(NB * R2, 3 * Cout)
            acc2 = acc2 + jnp.dot(lhs, w2_ref[kh],
                                  preferred_element_type=jnp.float32,
                                  precision=precision)
        y2 = jnp.maximum(acc2 * s2_ref[...] + b2_ref[...], 0.0)   # (NB*R2, Cp)

        # Single lane-dense contiguous slab store; junk cols/channels cropped
        # in glue.
        o_ref[...] = y2.reshape(NB, R2, Cp).astype(o_ref.dtype)

    return kernel, (H1, W1, H2, W2, Wpp, R2)


def downsample_forward(x_nchw, params, *, matmul_dtype=jnp.bfloat16,
                       precision=None):
    """MaxPool2d(2,2) -> (Conv3x3 valid -> BN(eval) -> ReLU) x 2.

    matmul_dtype: dtype fed to the MXU for the two im2col matmuls (bf16
    default; accumulation is always f32).  For strict f32 numerics pass
    matmul_dtype=jnp.float32 (optionally precision=lax.Precision.HIGHEST);
    the bf16 path matches the f32 reference to ~1e-1 abs/rel at unit-scale
    activations.
    """
    w1, s1, b1, w2, s2, b2 = params
    N, Cin, H, W = x_nchw.shape
    assert H % 2 == 0 and W % 2 == 0
    Hp, Wp = H // 2, W // 2
    assert Hp >= 5 and Wp >= 5, "need at least 5x5 after pooling for two valid 3x3 convs"
    Cout = w1.shape[-1]
    # Lane-dense final store: pad conv2's output channels up to a multiple of
    # 128 lanes (zero extra MXU column blocks for Cout <= 128; junk channels
    # are cropped in glue).
    Cp = _round_up(Cout, LANE)

    mm_bytes = jnp.dtype(matmul_dtype).itemsize
    vmem_cap, n_cores = _tpu_vmem_and_cores()
    vmem_limit = int(min(vmem_cap * 3 // 4, 96 * 2**20))
    per_img = _per_image_vmem_bytes(Hp, Wp, Cin, Cout, Cp, mm_bytes)
    budget = vmem_limit // 2                       # headroom for weights/temps
    max_nb = max(1, min(8, budget // max(per_img, 1)))
    NB = _pick_nb(N, max_nb, prefer_even_steps=(n_cores >= 2))

    kernel, (H1, W1, H2, W2, Wpp, R2) = make_downsample_kernel(
        NB, Hp, Wp, Cin, Cout, Cp, matmul_dtype, precision)

    # NCHW -> NHWC, pack the 2x2 pooling window: (N, Hp, 2, Wp, 2*Cin).
    x_packed = jnp.transpose(x_nchw, (0, 2, 3, 1)).reshape(N, Hp, 2, Wp, 2 * Cin)

    # Weights as (kh, kw*cin, cout) so each kh slab is one contiguous rhs.
    w1f = w1.reshape(3, 3 * Cin, Cout).astype(matmul_dtype)
    w2f = w2.reshape(3, 3 * Cout, Cout)
    s2p, b2p = s2, b2
    if Cp != Cout:
        w2f = jnp.pad(w2f, ((0, 0), (0, 0), (0, Cp - Cout)))
        s2p = jnp.pad(s2, ((0, 0), (0, Cp - Cout)))
        b2p = jnp.pad(b2, ((0, 0), (0, Cp - Cout)))
    w2f = w2f.astype(matmul_dtype)

    cost = pl.CostEstimate(
        flops=int(2 * N * (H1 * W1 * 9 * Cin * Cout + H2 * W2 * 9 * Cout * Cout)),
        transcendentals=0,
        bytes_accessed=int(N * Hp * 2 * Wp * 2 * Cin * 4
                           + N * R2 * Cp * 4
                           + (w1f.size + w2f.size) * mm_bytes
                           + (s1.size + b1.size + s2p.size + b2p.size) * 4),
    )

    out = pl.pallas_call(
        kernel,
        out_shape=jax.ShapeDtypeStruct((N, R2, Cp), jnp.float32),
        grid_spec=pltpu.PrefetchScalarGridSpec(
            num_scalar_prefetch=0,
            grid=(N // NB,),
            in_specs=[
                pl.BlockSpec((NB, Hp, 2, Wp, 2 * Cin),
                             lambda n: (n, 0, 0, 0, 0)),
                # Weight/scale/bias index_maps are constant, so Pallas DMAs
                # them only once (no per-step refetch).
                pl.BlockSpec((3, 3 * Cin, Cout), lambda n: (0, 0, 0)),
                pl.BlockSpec((1, Cout), lambda n: (0, 0)),
                pl.BlockSpec((1, Cout), lambda n: (0, 0)),
                pl.BlockSpec((3, 3 * Cout, Cp), lambda n: (0, 0, 0)),
                pl.BlockSpec((1, Cp), lambda n: (0, 0)),
                pl.BlockSpec((1, Cp), lambda n: (0, 0)),
            ],
            out_specs=pl.BlockSpec((NB, R2, Cp), lambda n: (n, 0, 0)),
        ),
        compiler_params=pltpu.CompilerParams(
            dimension_semantics=("parallel",),     # batch axis is independent
            vmem_limit_bytes=vmem_limit),
        cost_estimate=cost,
    )(x_packed, w1f, s1, b1, w2f, s2p, b2p)

    # (N, H2*Wpp, Cp) -> crop junk columns / channels -> NCHW (PyTorch layout).
    out = out.reshape(N, H2, Wpp, Cp)[:, :, :W2, :Cout]
    return jnp.transpose(out, (0, 3, 1, 2))


def init_params(key, Cin, Cout):
    """Deterministic synthetic params; conv bias + eval-mode BN folded."""
    eps = 1e-5
    ks = jax.random.split(key, 12)

    def fold(gamma, beta, rmean, rvar, conv_bias):
        scale = gamma / jnp.sqrt(rvar + eps)
        bias = beta + (conv_bias - rmean) * scale
        return scale.reshape(1, -1), bias.reshape(1, -1)

    # conv weights in HWIO layout
    w1 = jax.random.normal(ks[0], (3, 3, Cin, Cout), jnp.float32) * 0.2
    cb1 = jax.random.normal(ks[1], (Cout,), jnp.float32) * 0.1
    g1 = 1.0 + 0.2 * jax.random.normal(ks[2], (Cout,), jnp.float32)
    be1 = 0.1 * jax.random.normal(ks[3], (Cout,), jnp.float32)
    rm1 = 0.1 * jax.random.normal(ks[4], (Cout,), jnp.float32)
    rv1 = 0.5 + jax.random.uniform(ks[5], (Cout,), jnp.float32)
    s1, b1 = fold(g1, be1, rm1, rv1, cb1)

    w2 = jax.random.normal(ks[6], (3, 3, Cout, Cout), jnp.float32) * 0.2
    cb2 = jax.random.normal(ks[7], (Cout,), jnp.float32) * 0.1
    g2 = 1.0 + 0.2 * jax.random.normal(ks[8], (Cout,), jnp.float32)
    be2 = 0.1 * jax.random.normal(ks[9], (Cout,), jnp.float32)
    rm2 = 0.1 * jax.random.normal(ks[10], (Cout,), jnp.float32)
    rv2 = 0.5 + jax.random.uniform(ks[11], (Cout,), jnp.float32)
    s2, b2 = fold(g2, be2, rm2, rv2, cb2)

    return (w1, s1, b1, w2, s2, b2)


def ref_forward(x_nchw, params):
    """Pure-JAX reference with the same folded BN affine."""
    w1, s1, b1, w2, s2, b2 = params
    x = jnp.transpose(x_nchw, (0, 2, 3, 1))
    p = lax.reduce_window(x, -jnp.inf, lax.max,
                          (1, 2, 2, 1), (1, 2, 2, 1), 'VALID')
    y = lax.conv_general_dilated(p, w1, (1, 1), 'VALID',
                                 dimension_numbers=('NHWC', 'HWIO', 'NHWC'))
    y = jnp.maximum(y * s1.reshape(1, 1, 1, -1) + b1.reshape(1, 1, 1, -1), 0.0)
    z = lax.conv_general_dilated(y, w2, (1, 1), 'VALID',
                                 dimension_numbers=('NHWC', 'HWIO', 'NHWC'))
    z = jnp.maximum(z * s2.reshape(1, 1, 1, -1) + b2.reshape(1, 1, 1, -1), 0.0)
    return jnp.transpose(z, (0, 3, 1, 2))


if __name__ == "__main__":
    key = jax.random.PRNGKey(0)
    kx, kp = jax.random.split(key)

    N, Cin, H, W = 2, 4, 16, 16
    Cout = 8
    x = jax.random.normal(kx, (N, Cin, H, W), jnp.float32)
    params = init_params(kp, Cin, Cout)

    ref = ref_forward(x, params)
    expected_shape = (N, Cout, H // 2 - 4, W // 2 - 4)

    # Default path: bf16 MXU inputs, f32 accumulation (documented bf16 tolerance).
    out_bf16 = jax.block_until_ready(downsample_forward(x, params))
    assert out_bf16.shape == expected_shape, out_bf16.shape
    np.testing.assert_allclose(np.asarray(out_bf16), np.asarray(ref),
                               rtol=1e-1, atol=1e-1)

    # f32 MXU path: tight check of the kernel math.
    out_f32 = jax.block_until_ready(
        downsample_forward(x, params, matmul_dtype=jnp.float32))
    assert out_f32.shape == expected_shape, out_f32.shape
    np.testing.assert_allclose(np.asarray(out_f32), np.asarray(ref),
                               rtol=2e-4, atol=2e-4)

    print("KERNEL_OK")
</pallas_src>

<mosaic_0001>
module attributes {stable_mosaic.version = 11 : i64} {
  func.func @kernel(%arg0: i32, %arg1: memref<2x8x2x8x8xf32, #tpu.memory_space<vmem>>, %arg2: memref<3x12x8xbf16, #tpu.memory_space<vmem>>, %arg3: memref<1x8xf32, #tpu.memory_space<vmem>>, %arg4: memref<1x8xf32, #tpu.memory_space<vmem>>, %arg5: memref<3x24x128xbf16, #tpu.memory_space<vmem>>, %arg6: memref<1x128xf32, #tpu.memory_space<vmem>>, %arg7: memref<1x128xf32, #tpu.memory_space<vmem>>, %arg8: memref<2x32x128xf32, #tpu.memory_space<vmem>>) attributes {dimension_semantics = [#tpu.dimension_semantics<parallel>], iteration_bounds = array<i64: 1>, scalar_prefetch = 0 : i64, scratch_operands = 0 : i64, tpu.core_type = #tpu.core_type<tc>, window_params = [{transform_indices = @transform_0, window_bounds = array<i64: 2, 8, 2, 8, 8>}, {pipeline_mode = #tpu.pipeline_mode<synchronous>, transform_indices = @transform_1, window_bounds = array<i64: 3, 12, 8>}, {pipeline_mode = #tpu.pipeline_mode<synchronous>, transform_indices = @transform_2, window_bounds = array<i64: 1, 8>}, {pipeline_mode = #tpu.pipeline_mode<synchronous>, transform_indices = @transform_3, window_bounds = array<i64: 1, 8>}, {pipeline_mode = #tpu.pipeline_mode<synchronous>, transform_indices = @transform_4, window_bounds = array<i64: 3, 24, 128>}, {pipeline_mode = #tpu.pipeline_mode<synchronous>, transform_indices = @transform_5, window_bounds = array<i64: 1, 128>}, {pipeline_mode = #tpu.pipeline_mode<synchronous>, transform_indices = @transform_6, window_bounds = array<i64: 1, 128>}, {transform_indices = @transform_7, window_bounds = array<i64: 2, 32, 128>}]} {
    %c0 = arith.constant 0 : index
    %c0_0 = arith.constant 0 : index
    %c0_1 = arith.constant 0 : index
    %c0_2 = arith.constant 0 : index
    %c0_3 = arith.constant 0 : index
    %0 = vector.load %arg1[%c0, %c0_0, %c0_1, %c0_2, %c0_3] : memref<2x8x2x8x8xf32, #tpu.memory_space<vmem>>, vector<2x8x2x8x8xf32>
    %1 = vector.extract_strided_slice %0 {offsets = [0, 0, 0, 0, 0], sizes = [2, 8, 1, 8, 8], strides = [1, 1, 1, 1, 1]} : vector<2x8x2x8x8xf32> to vector<2x8x1x8x8xf32>
    %2 = vector.shape_cast %1 : vector<2x8x1x8x8xf32> to vector<2x8x8x8xf32>
    %3 = vector.extract_strided_slice %0 {offsets = [0, 0, 1, 0, 0], sizes = [2, 8, 1, 8, 8], strides = [1, 1, 1, 1, 1]} : vector<2x8x2x8x8xf32> to vector<2x8x1x8x8xf32>
    %4 = vector.shape_cast %3 : vector<2x8x1x8x8xf32> to vector<2x8x8x8xf32>
    %5 = arith.maximumf %2, %4 : vector<2x8x8x8xf32>
    %6 = vector.extract_strided_slice %5 {offsets = [0, 0, 0, 0], sizes = [2, 8, 8, 4], strides = [1, 1, 1, 1]} : vector<2x8x8x8xf32> to vector<2x8x8x4xf32>
    %7 = vector.extract_strided_slice %5 {offsets = [0, 0, 0, 4], sizes = [2, 8, 8, 4], strides = [1, 1, 1, 1]} : vector<2x8x8x8xf32> to vector<2x8x8x4xf32>
    %8 = arith.maximumf %6, %7 : vector<2x8x8x4xf32>
    %9 = vector.shape_cast %8 : vector<2x8x8x4xf32> to vector<128x4xf32>
    %c127_i32 = arith.constant 127 : i32
    %10 = tpu.dynamic_rotate %9 by %c127_i32 dim 0 : vector<128x4xf32>, i32 -> vector<128x4xf32>
    %c126_i32 = arith.constant 126 : i32
    %11 = tpu.dynamic_rotate %9 by %c126_i32 dim 0 : vector<128x4xf32>, i32 -> vector<128x4xf32>
    %12 = tpu.concatenate %9, %10, %11 in 1 : vector<128x4xf32>, vector<128x4xf32>, vector<128x4xf32> -> vector<128x12xf32>
    %13 = arith.truncf %12 : vector<128x12xf32> to vector<128x12xbf16>
    %14 = vector.shape_cast %13 : vector<128x12xbf16> to vector<2x64x12xbf16>
    %cst = arith.constant 0.000000e+00 : f32
    %15 = vector.broadcast %cst : f32 to vector<96x8xf32>
    %16 = vector.extract_strided_slice %14 {offsets = [0, 0, 0], sizes = [2, 48, 12], strides = [1, 1, 1]} : vector<2x64x12xbf16> to vector<2x48x12xbf16>
    %17 = vector.shape_cast %16 : vector<2x48x12xbf16> to vector<96x12xbf16>
    %c0_4 = arith.constant 0 : index
    %c0_5 = arith.constant 0 : index
    %c0_6 = arith.constant 0 : index
    %18 = vector.load %arg2[%c0_4, %c0_5, %c0_6] : memref<3x12x8xbf16, #tpu.memory_space<vmem>>, vector<1x12x8xbf16>
    %19 = vector.shape_cast %18 : vector<1x12x8xbf16> to vector<12x8xbf16>
    %cst_7 = arith.constant dense<0.000000e+00> : vector<96x8xf32>
    %20 = tpu.matmul %17, %19, %cst_7 {dimension_numbers = #tpu.dot_dimension_numbers<[1], [0], [0], [1], [0, 0, 1, 1], [], []>} : vector<96x12xbf16>, vector<12x8xbf16>, vector<96x8xf32> -> vector<96x8xf32>
    %21 = arith.addf %15, %20 : vector<96x8xf32>
    %22 = vector.extract_strided_slice %14 {offsets = [0, 8, 0], sizes = [2, 48, 12], strides = [1, 1, 1]} : vector<2x64x12xbf16> to vector<2x48x12xbf16>
    %23 = vector.shape_cast %22 : vector<2x48x12xbf16> to vector<96x12xbf16>
    %c1 = arith.constant 1 : index
    %c0_8 = arith.constant 0 : index
    %c0_9 = arith.constant 0 : index
    %24 = vector.load %arg2[%c1, %c0_8, %c0_9] : memref<3x12x8xbf16, #tpu.memory_space<vmem>>, vector<1x12x8xbf16>
    %25 = vector.shape_cast %24 : vector<1x12x8xbf16> to vector<12x8xbf16>
    %cst_10 = arith.constant dense<0.000000e+00> : vector<96x8xf32>
    %26 = tpu.matmul %23, %25, %cst_10 {dimension_numbers = #tpu.dot_dimension_numbers<[1], [0], [0], [1], [0, 0, 1, 1], [], []>} : vector<96x12xbf16>, vector<12x8xbf16>, vector<96x8xf32> -> vector<96x8xf32>
    %27 = arith.addf %21, %26 : vector<96x8xf32>
    %28 = vector.extract_strided_slice %14 {offsets = [0, 16, 0], sizes = [2, 48, 12], strides = [1, 1, 1]} : vector<2x64x12xbf16> to vector<2x48x12xbf16>
    %29 = vector.shape_cast %28 : vector<2x48x12xbf16> to vector<96x12xbf16>
    %c2 = arith.constant 2 : index
    %c0_11 = arith.constant 0 : index
    %c0_12 = arith.constant 0 : index
    %30 = vector.load %arg2[%c2, %c0_11, %c0_12] : memref<3x12x8xbf16, #tpu.memory_space<vmem>>, vector<1x12x8xbf16>
    %31 = vector.shape_cast %30 : vector<1x12x8xbf16> to vector<12x8xbf16>
    %cst_13 = arith.constant dense<0.000000e+00> : vector<96x8xf32>
    %32 = tpu.matmul %29, %31, %cst_13 {dimension_numbers = #tpu.dot_dimension_numbers<[1], [0], [0], [1], [0, 0, 1, 1], [], []>} : vector<96x12xbf16>, vector<12x8xbf16>, vector<96x8xf32> -> vector<96x8xf32>
    %33 = arith.addf %27, %32 : vector<96x8xf32>
    %c0_14 = arith.constant 0 : index
    %c0_15 = arith.constant 0 : index
    %34 = vector.load %arg3[%c0_14, %c0_15] : memref<1x8xf32, #tpu.memory_space<vmem>>, vector<1x8xf32>
    %35 = vector.broadcast %34 : vector<1x8xf32> to vector<96x8xf32>
    %36 = arith.mulf %33, %35 : vector<96x8xf32>
    %c0_16 = arith.constant 0 : index
    %c0_17 = arith.constant 0 : index
    %37 = vector.load %arg4[%c0_16, %c0_17] : memref<1x8xf32, #tpu.memory_space<vmem>>, vector<1x8xf32>
    %38 = vector.broadcast %37 : vector<1x8xf32> to vector<96x8xf32>
    %39 = arith.addf %36, %38 : vector<96x8xf32>
    %cst_18 = arith.constant 0.000000e+00 : f32
    %40 = vector.broadcast %cst_18 : f32 to vector<96x8xf32>
    %41 = arith.maximumf %39, %40 : vector<96x8xf32>
    %c95_i32 = arith.constant 95 : i32
    %42 = tpu.dynamic_rotate %41 by %c95_i32 dim 0 : vector<96x8xf32>, i32 -> vector<96x8xf32>
    %c94_i32 = arith.constant 94 : i32
    %43 = tpu.dynamic_rotate %41 by %c94_i32 dim 0 : vector<96x8xf32>, i32 -> vector<96x8xf32>
    %44 = tpu.concatenate %41, %42, %43 in 1 : vector<96x8xf32>, vector<96x8xf32>, vector<96x8xf32> -> vector<96x24xf32>
    %45 = arith.truncf %44 : vector<96x24xf32> to vector<96x24xbf16>
    %46 = vector.shape_cast %45 : vector<96x24xbf16> to vector<2x48x24xbf16>
    %cst_19 = arith.constant 0.000000e+00 : f32
    %47 = vector.broadcast %cst_19 : f32 to vector<64x128xf32>
    %48 = vector.extract_strided_slice %46 {offsets = [0, 0, 0], sizes = [2, 32, 24], strides = [1, 1, 1]} : vector<2x48x24xbf16> to vector<2x32x24xbf16>
    %49 = vector.shape_cast %48 : vector<2x32x24xbf16> to vector<64x24xbf16>
    %c0_20 = arith.constant 0 : index
    %c0_21 = arith.constant 0 : index
    %c0_22 = arith.constant 0 : index
    %50 = vector.load %arg5[%c0_20, %c0_21, %c0_22] : memref<3x24x128xbf16, #tpu.memory_space<vmem>>, vector<1x24x128xbf16>
    %51 = vector.shape_cast %50 : vector<1x24x128xbf16> to vector<24x128xbf16>
    %cst_23 = arith.constant dense<0.000000e+00> : vector<64x128xf32>
    %52 = tpu.matmul %49, %51, %cst_23 {dimension_numbers = #tpu.dot_dimension_numbers<[1], [0], [0], [1], [0, 0, 1, 1], [], []>} : vector<64x24xbf16>, vector<24x128xbf16>, vector<64x128xf32> -> vector<64x128xf32>
    %53 = arith.addf %47, %52 : vector<64x128xf32>
    %54 = vector.extract_strided_slice %46 {offsets = [0, 8, 0], sizes = [2, 32, 24], strides = [1, 1, 1]} : vector<2x48x24xbf16> to vector<2x32x24xbf16>
    %55 = vector.shape_cast %54 : vector<2x32x24xbf16> to vector<64x24xbf16>
    %c1_24 = arith.constant 1 : index
    %c0_25 = arith.constant 0 : index
    %c0_26 = arith.constant 0 : index
    %56 = vector.load %arg5[%c1_24, %c0_25, %c0_26] : memref<3x24x128xbf16, #tpu.memory_space<vmem>>, vector<1x24x128xbf16>
    %57 = vector.shape_cast %56 : vector<1x24x128xbf16> to vector<24x128xbf16>
    %cst_27 = arith.constant dense<0.000000e+00> : vector<64x128xf32>
    %58 = tpu.matmul %55, %57, %cst_27 {dimension_numbers = #tpu.dot_dimension_numbers<[1], [0], [0], [1], [0, 0, 1, 1], [], []>} : vector<64x24xbf16>, vector<24x128xbf16>, vector<64x128xf32> -> vector<64x128xf32>
    %59 = arith.addf %53, %58 : vector<64x128xf32>
    %60 = vector.extract_strided_slice %46 {offsets = [0, 16, 0], sizes = [2, 32, 24], strides = [1, 1, 1]} : vector<2x48x24xbf16> to vector<2x32x24xbf16>
    %61 = vector.shape_cast %60 : vector<2x32x24xbf16> to vector<64x24xbf16>
    %c2_28 = arith.constant 2 : index
    %c0_29 = arith.constant 0 : index
    %c0_30 = arith.constant 0 : index
    %62 = vector.load %arg5[%c2_28, %c0_29, %c0_30] : memref<3x24x128xbf16, #tpu.memory_space<vmem>>, vector<1x24x128xbf16>
    %63 = vector.shape_cast %62 : vector<1x24x128xbf16> to vector<24x128xbf16>
    %cst_31 = arith.constant dense<0.000000e+00> : vector<64x128xf32>
    %64 = tpu.matmul %61, %63, %cst_31 {dimension_numbers = #tpu.dot_dimension_numbers<[1], [0], [0], [1], [0, 0, 1, 1], [], []>} : vector<64x24xbf16>, vector<24x128xbf16>, vector<64x128xf32> -> vector<64x128xf32>
    %65 = arith.addf %59, %64 : vector<64x128xf32>
    %c0_32 = arith.constant 0 : index
    %c0_33 = arith.constant 0 : index
    %66 = vector.load %arg6[%c0_32, %c0_33] : memref<1x128xf32, #tpu.memory_space<vmem>>, vector<1x128xf32>
    %67 = vector.broadcast %66 : vector<1x128xf32> to vector<64x128xf32>
    %68 = arith.mulf %65, %67 : vector<64x128xf32>
    %c0_34 = arith.constant 0 : index
    %c0_35 = arith.constant 0 : index
    %69 = vector.load %arg7[%c0_34, %c0_35] : memref<1x128xf32, #tpu.memory_space<vmem>>, vector<1x128xf32>
    %70 = vector.broadcast %69 : vector<1x128xf32> to vector<64x128xf32>
    %71 = arith.addf %68, %70 : vector<64x128xf32>
    %cst_36 = arith.constant 0.000000e+00 : f32
    %72 = vector.broadcast %cst_36 : f32 to vector<64x128xf32>
    %73 = arith.maximumf %71, %72 : vector<64x128xf32>
    %74 = vector.shape_cast %73 : vector<64x128xf32> to vector<2x32x128xf32>
    %c0_37 = arith.constant 0 : index
    %c0_38 = arith.constant 0 : index
    %c0_39 = arith.constant 0 : index
    %75 = vector.load %arg8[%c0_37, %c0_38, %c0_39] : memref<2x32x128xf32, #tpu.memory_space<vmem>>, vector<2x32x128xf32>
    tpu.vector_store %arg8[%c0_37, %c0_38, %c0_39], %74 {strides = array<i32>} : memref<2x32x128xf32, #tpu.memory_space<vmem>>, vector<2x32x128xf32>,
    return
  }
  func.func @transform_0(%arg0: i32) -> (i32, i32, i32, i32, i32) {
    %c0_i32 = arith.constant 0 : i32
    %c0_i32_0 = arith.constant 0 : i32
    %c0_i32_1 = arith.constant 0 : i32
    %c0_i32_2 = arith.constant 0 : i32
    %c0_i32_3 = arith.constant 0 : i32
    return %arg0, %c0_i32, %c0_i32_0, %c0_i32_1, %c0_i32_2 : i32, i32, i32, i32, i32
  }
  func.func @transform_1(%arg0: i32) -> (i32, i32, i32) {
    %c0_i32 = arith.constant 0 : i32
    %c0_i32_0 = arith.constant 0 : i32
    %c0_i32_1 = arith.constant 0 : i32
    %c0_i32_2 = arith.constant 0 : i32
    return %c0_i32, %c0_i32_0, %c0_i32_1 : i32, i32, i32
  }
  func.func @transform_2(%arg0: i32) -> (i32, i32) {
    %c0_i32 = arith.constant 0 : i32
    %c0_i32_0 = arith.constant 0 : i32
    %c0_i32_1 = arith.constant 0 : i32
    return %c0_i32, %c0_i32_0 : i32, i32
  }
  func.func @transform_3(%arg0: i32) -> (i32, i32) {
    %c0_i32 = arith.constant 0 : i32
    %c0_i32_0 = arith.constant 0 : i32
    %c0_i32_1 = arith.constant 0 : i32
    return %c0_i32, %c0_i32_0 : i32, i32
  }
  func.func @transform_4(%arg0: i32) -> (i32, i32, i32) {
    %c0_i32 = arith.constant 0 : i32
    %c0_i32_0 = arith.constant 0 : i32
    %c0_i32_1 = arith.constant 0 : i32
    %c0_i32_2 = arith.constant 0 : i32
    return %c0_i32, %c0_i32_0, %c0_i32_1 : i32, i32, i32
  }
  func.func @transform_5(%arg0: i32) -> (i32, i32) {
    %c0_i32 = arith.constant 0 : i32
    %c0_i32_0 = arith.constant 0 : i32
    %c0_i32_1 = arith.constant 0 : i32
    return %c0_i32, %c0_i32_0 : i32, i32
  }
  func.func @transform_6(%arg0: i32) -> (i32, i32) {
    %c0_i32 = arith.constant 0 : i32
    %c0_i32_0 = arith.constant 0 : i32
    %c0_i32_1 = arith.constant 0 : i32
    return %c0_i32, %c0_i32_0 : i32, i32
  }
  func.func @transform_7(%arg0: i32) -> (i32, i32, i32) {
    %c0_i32 = arith.constant 0 : i32
    %c0_i32_0 = arith.constant 0 : i32
    %c0_i32_1 = arith.constant 0 : i32
    return %arg0, %c0_i32, %c0_i32_0 : i32, i32, i32
  }
}

</mosaic_0001>

<bundles_post_ra>
// kernel: tpu_custom_call.1
= control target key start
LH: loop header
LB: loop body
LE: loop exit
PB: predicated region body
PF: predicated region fallthrough
CT: control target
= control target key end

     0   :  { %12 = vsyncpa [#allocation3], 0  ;;  %s2379_s0 = inlined_call_operand.hbm [shape: f32[2,8,2,8,8], index: 0, kind: input, shape index: {}]   ;;  %s2380_s1 = inlined_call_operand.vmem [shape: bf16[3,12,8], index: 1, kind: input, shape index: {}]   ;;  %s2381_s2 = inlined_call_operand.vmem [shape: f32[1,8], index: 2, kind: input, shape index: {}]   ;;  %s2382_s3 = inlined_call_operand.vmem [shape: f32[1,8], index: 3, kind: input, shape index: {}]   ;;  %s2383_s4 = inlined_call_operand.vmem [shape: bf16[3,24,128], index: 4, kind: input, shape index: {}]   ;;  %s2384_s5 = inlined_call_operand.vmem [shape: f32[1,128], index: 5, kind: input, shape index: {}]   ;;  %s2385_s6 = inlined_call_operand.vmem [shape: f32[1,128], index: 6, kind: input, shape index: {}]   ;;  %s2386_s7 = inlined_call_operand.hbm [shape: f32[2,32,128], index: 7, kind: output, shape index: {}]  }
   0x1   :  { %13 = vsyncpa [#allocation4], 0  ;;  %s1759_s24 = smov [#allocation2]  }
   0x2   :  { %s19_s25 = sshll.u32 %s1759_s24, 4  ;;  %s20_s25 = int_to_ptr.vmem [resolvable:$true] %s19_s25 }
   0x3   :  { %s1723_s26 = scalar_lea.vmem %s20_s25, 4096  ;;  %p1728_p1 = scmp.lt.s32.totalorder %s20_s25, %s20_s25 }
   0x4   :  { %p1724_p0 = scmp.ne.s32.totalorder %s20_s25, %s1723_s26  ;;  %p1729_p2 = scmp.lt.s32.totalorder %s1723_s26, %s1723_s26 }
   0x6   :  { %p1730_p3 = por %p1729_p2, %p1728_p1 }
   0x8   :  { %p1731_p4 = pnand %p1730_p3, %p1724_p0 }
   0xa   :  { %1734 = shalt.err (!%p1731_p4)
}
   0xb   :  { %s1760_s27 = smov 128   ;;  %s1761_s28 = smov 8  }
   0xc   :  { %25 = dma.hbm_to_vmem [thread:$0]  %s2379_s0, 4096, %s20_s25, [#allocation3], %s1760_s27, %s1760_s27, %s1761_s28  }
   0xd   :  { %1755 = dma.done.wait [#allocation3], 4096  }
   0xe   :  { %1756 = vsyncadd [#allocation3], 4294963200  ;;  %v50_v0 = vld [vmem:[#allocation2 + $0x40] sm:$0xff]  ;;  %v51_v1 = vld [vmem:[#allocation2 + $0x48] sm:$0xff]  ;;  %s1762_s0 = smov 124   ;;  %v186_v61 = vlaneseq  ;;  %s1763_s8 = smov 4  }
   0xf   :  { %v52_v2 = vld [vmem:[#allocation2 + $0x50] sm:$0xff]  ;;  %v53_v3 = vld [vmem:[#allocation2 + $0x58] sm:$0xff]  ;;  %v1812_v4 = vmax.f32 %v50_v0, %v51_v1  ;;  %v42_v5 = vld [vmem:[#allocation2] sm:$0xff]  ;;  %vm460_vm2 = vcmask 1045504   ;;  %vm366_vm3 = vcmask 31744   ;;  %vm383_vm4 = vcmask 64512  }
  0x10   :  { %v43_v6 = vld [vmem:[#allocation2 + $0x8] sm:$0xff]  ;;  %v1814_v7 = vmax.f32 %v52_v2, %v53_v3  ;;  %v44_v8 = vld [vmem:[#allocation2 + $0x10] sm:$0xff]  ;;  %v45_v9 = vld [vmem:[#allocation2 + $0x18] sm:$0xff]  ;;  %vm441_vm5 = vcmask 97280   ;;  %vm418_vm6 = vcmask 1043456   ;;  %s1764_s20 = smov 16  }
  0x11   :  { %v1816_v10 = vmax.f32 %v42_v5, %v43_v6  ;;  %v54_v11 = vld [vmem:[#allocation2 + $0x60] sm:$0xff]  ;;  %v75_v12 = vmax.f32 %v44_v8, %v45_v9  ;;  %v55_v13 = vld [vmem:[#allocation2 + $0x68] sm:$0xff]  ;;  %v56_v14 = vld [vmem:[#allocation2 + $0x70] sm:$0xff]  ;;  %v1871_v9 = vshrl.u32 %v186_v61, 7  ;;  %vm968_vm7 = vcmask 130048  }
  0x12   :  { %v57_v15 = vld [vmem:[#allocation2 + $0x78] sm:$0xff]  ;;  %v1541_v16 = vpack.i.bf16 %v1814_v7, %v1812_v4  ;;  %v1820_v17 = vmax.f32 %v54_v11, %v55_v13  ;;  %v46_v19 = vld [vmem:[#allocation2 + $0x20] sm:$0xff]  ;;  %v47_v20 = vld [vmem:[#allocation2 + $0x28] sm:$0xff]  ;;  %vm1019_vm8 = vcmask 195584  }
  0x13   :  { %v1822_v18 = vmax.f32 %v56_v14, %v57_v15  ;;  %v48_v21 = vld [vmem:[#allocation2 + $0x30] sm:$0xff]  ;;  %v1531_v22 = vpack.i.bf16 %v75_v12, %v1816_v10  ;;  %v49_v23 = vld [vmem:[#allocation2 + $0x38] sm:$0xff]  ;;  %v76_v24 = vmax.f32 %v46_v19, %v47_v20  ;;  %v58_v25 = vld [vmem:[#allocation2 + $0x80] sm:$0xff]  ;;  %vm188_vm0 = vcmp.lt.s32.totalorder %v1871_v9, 7 }
  0x14   :  { %v59_v26 = vld [vmem:[#allocation2 + $0x88] sm:$0xff]  ;;  %1542 = vrot.lane.b32.xlu1 %v1541_v16, %s1762_s0  ;;  %v77_v28 = vmax.f32 %v48_v21, %v49_v23  ;;  %v60_v29 = vld [vmem:[#allocation2 + $0x90] sm:$0xff]  ;;  %v61_v30 = vld [vmem:[#allocation2 + $0x98] sm:$0xff]  ;;  %vm221_vm1 = vcmp.lt.s32.totalorder %v1871_v9, 6 }
  0x15   :  { %v1546_v27 = vpack.i.bf16 %v1822_v18, %v1820_v17  ;;  %v62_v31 = vld [vmem:[#allocation2 + $0xa0] sm:$0xff]  ;;  %1532 = vrot.lane.b32.xlu0 %v1531_v22, %s1762_s0  ;;  %v1829_v32 = vmax.f32 %v58_v25, %v59_v26  ;;  %v1831_v33 = vmax.f32 %v60_v29, %v61_v30  ;;  %v63_v34 = vld [vmem:[#allocation2 + $0xa8] sm:$0xff]  ;;  %v64_v35 = vld [vmem:[#allocation2 + $0xb0] sm:$0xff] }
  0x16   :  { %v65_v36 = vld [vmem:[#allocation2 + $0xb8] sm:$0xff]  ;;  %v1536_v37 = vpack.i.bf16 %v77_v28, %v76_v24  ;;  %v1833_v38 = vmax.f32 %v62_v31, %v63_v34  ;;  %v68_v40 = vld [vmem:[#allocation2 + $0xd0] sm:$0xff]  ;;  %v70_v42 = vld [vmem:[#allocation2 + $0xe0] sm:$0xff] }
  0x17   :  { %v1835_v39 = vmax.f32 %v64_v35, %v65_v36  ;;  %v69_v41 = vld [vmem:[#allocation2 + $0xd8] sm:$0xff]  ;;  %v71_v43 = vld [vmem:[#allocation2 + $0xe8] sm:$0xff]  ;;  %v66_v45 = vld [vmem:[#allocation2 + $0xc0] sm:$0xff]  ;;  %v1551_v49 = vpack.i.bf16 %v1831_v33, %v1829_v32 }
  0x18   :  { %1547 = vrot.lane.b32.xlu1 %v1546_v27, %s1762_s0  ;;  %v67_v46 = vld [vmem:[#allocation2 + $0xc8] sm:$0xff]  ;;  %v1840_v47 = vmax.f32 %v68_v40, %v69_v41  ;;  %v1842_v48 = vmax.f32 %v70_v42, %v71_v43  ;;  %v72_v52 = vld [vmem:[#allocation2 + $0xf0] sm:$0xff]  ;;  %v73_v53 = vld [vmem:[#allocation2 + $0xf8] sm:$0xff] }
  0x19   :  { %v1556_v44 = vpack.i.bf16 %v1835_v39, %v1833_v38  ;;  %1537 = vrot.lane.b32.xlu0 %v1536_v37, %s1762_s0  ;;  %v1851_v51 = vmax.f32 %v66_v45, %v67_v46  ;;  %v1856_v54 = vmax.f32 %v72_v52, %v73_v53 }
  0x1a   :  { %v1561_v50 = vpack.i.bf16 %v1842_v48, %v1840_v47 }
  0x1c   :  { %1557 = vrot.lane.b32.xlu1 %v1556_v44, %s1762_s0 }
  0x1d   :  { %1552 = vrot.lane.b32.xlu0 %v1551_v49, %s1762_s0 }
  0x20   :  { %1562 = vrot.lane.b32.xlu1 %v1561_v50, %s1762_s0 }
  0x21   :  { %130 = vrot.lane.b32.xlu0 %v1851_v51, %s1762_s0 }
  0x25   :  { %136 = vrot.lane.b32.xlu0 %v1856_v54, %s1762_s0 }
  0x86   :  { %v1543_v55 = vpop.permute.xlu1 %1542 }
  0x87   :  { %v1544_v56 = vunpack.i.l.bf16 %v1543_v55  ;;  %v1533_v57 = vpop.permute.xlu0 %1532  ;;  %v1545_v60 = vunpack.i.h.bf16 %v1543_v55 }
  0x88   :  { %v1535_v58 = vunpack.i.h.bf16 %v1533_v57  ;;  %v1534_v59 = vunpack.i.l.bf16 %v1533_v57 }
  0x89   :  { %v1861_v62 = vmax.f32 %v1812_v4, %v1544_v56  ;;  %v1869_v8 = vmax.f32 %v1814_v7, %v1545_v60 }
  0x8a   :  { %v1548_v63 = vpop.permute.xlu1 %1547  ;;  %v1863_v0 = vmax.f32 %v75_v12, %v1535_v58  ;;  %v1866_v3 = vmax.f32 %v1816_v10, %v1534_v59 }
  0x8b   :  { %v1549_v1 = vunpack.i.l.bf16 %v1548_v63  ;;  %v1538_v2 = vpop.permute.xlu0 %1537  ;;  %v174_v11 = vrot.slane %v1861_v62, 1  ;;  %v1550_v15 = vunpack.i.h.bf16 %v1548_v63  ;;  %v175_v23 = vrot.slane %v1869_v8, 1 }
  0x8c   :  { %v1540_v5 = vunpack.i.h.bf16 %v1538_v2  ;;  %v1539_v6 = vunpack.i.l.bf16 %v1538_v2  ;;  %v171_v14 = vrot.slane %v1863_v0, 1  ;;  %v170_v7 = vrot.slane %v1866_v3, 1 }
  0x8d   :  { %v1880_v10 = vmax.f32 %v1820_v17, %v1549_v1  ;;  %v205_v27 = vrot.slane %v1866_v3, 2  ;;  %v1903_v34 = vmax.f32 %v1822_v18, %v1550_v15  ;;  %v209_v46 = vrot.slane %v1861_v62, 2 }
  0x8e   :  { %v1874_v13 = vmax.f32 %v77_v28, %v1540_v5  ;;  %v1876_v4 = vmax.f32 %v76_v24, %v1539_v6  ;;  %v1558_v12 = vpop.permute.xlu1 %1557  ;;  %v206_v28 = vrot.slane %v1863_v0, 2  ;;  %v203_v36 = vsel %vm188_vm0, %v170_v7, %v171_v14 }
  0x8f   :  { %v1553_v16 = vpop.permute.xlu0 %1552  ;;  %v1559_v19 = vunpack.i.l.bf16 %v1558_v12  ;;  %v176_v29 = vrot.slane %v1880_v10, 1  ;;  %v1560_v40 = vunpack.i.h.bf16 %v1558_v12  ;;  %v210_v50 = vrot.slane %v1869_v8, 2 }
  0x90   :  { %v173_v20 = vrot.slane %v1874_v13, 1  ;;  %v172_v21 = vrot.slane %v1876_v4, 1  ;;  %v1555_v22 = vunpack.i.h.bf16 %v1553_v16  ;;  %v1554_v24 = vunpack.i.l.bf16 %v1553_v16 }
  0x91   :  { %v207_v25 = vrot.slane %v1876_v4, 2  ;;  %v1899_v31 = vmax.f32 %v1833_v38, %v1559_v19  ;;  %v236_v41 = vsel %vm221_vm1, %v205_v27, %v206_v28  ;;  %v198_v45 = vsel %vm188_vm0, %v175_v23, %v176_v29 }
  0x92   :  { %v200_v17 = vsel %vm188_vm0, %v173_v20, %v174_v11  ;;  %v201_v26 = vsel %vm188_vm0, %v172_v21, %v173_v20  ;;  %v1896_v30 = vmax.f32 %v1831_v33, %v1555_v22  ;;  %v1910_v37 = vmax.f32 %v1829_v32, %v1554_v24  ;;  %v1563_v57 = vpop.permute.xlu1 %1562 }
  0x93   :  { %v1571_v35 = vpack.i.bf16 %v200_v17, %v201_v26  ;;  %v202_v33 = vsel %vm188_vm0, %v171_v14, %v172_v21  ;;  %v235_v38 = vsel %vm221_vm1, %v206_v28, %v207_v25  ;;  %v199_v32 = vsel %vm188_vm0, %v174_v11, %v175_v23  ;;  %v131_v44 = vpop.permute.xlu0 %130  ;;  %v1706_v26 = vld [vmem:[%s2380_s1] sm:$0x3f]   ;;  %v1707_v28 = vld [vmem:[%s2380_s1 + $0x8] sm:$0x3f]  }
  0x94   :  { %v1566_v18 = vpack.i.bf16 %v202_v33, %v203_v36  ;;  %v179_v42 = vrot.slane %v1896_v30, 1  ;;  %v180_v43 = vrot.slane %v1899_v31, 1  ;;  %v1581_v49 = vpack.i.bf16 %v235_v38, %v236_v41  ;;  %v1708_v33 = vld [vmem:[%s2380_s1 + $0x10] sm:$0x3f]   ;;  %1519 = vmatprep.subr.msk.bf16.mxu1 %vm460_vm2, %v1706_v26  ;;  %1518 = vmatprep.subr.msk.bf16.mxu0 %vm460_vm2, %v1707_v28 }
  0x95   :  { %1572 = vrot.lane.b32.xlu0 %v1571_v35, %s1763_s8  ;;  %v211_v52 = vrot.slane %v1880_v10, 2  ;;  %v177_v53 = vrot.slane %v1903_v34, 1  ;;  %v178_v55 = vrot.slane %v1910_v37, 1  ;;  %v1934_v56 = vmax.f32 %v1835_v39, %v1560_v40 }
  0x96   :  { %1567 = vrot.lane.b32.xlu1 %v1566_v18, %s1763_s8  ;;  %v208_v58 = vrot.slane %v1874_v13, 2  ;;  %v1938_v59 = vmax.f32 %v1851_v51, %v131_v44  ;;  %v1576_v60 = vpack.i.bf16 %v198_v45, %v199_v32  ;;  %v232_v63 = vsel %vm221_vm1, %v209_v46, %v210_v50 }
  0x97   :  { %v231_v61 = vsel %vm221_vm1, %v210_v50, %v211_v52  ;;  %v194_v2 = vsel %vm188_vm0, %v179_v42, %v180_v43  ;;  %v195_v51 = vsel %vm188_vm0, %v178_v55, %v179_v42  ;;  %v1565_v5 = vunpack.i.h.bf16 %v1563_v57  ;;  %v137_v11 = vpop.permute.xlu0 %136 }
  0x98   :  { %v233_v1 = vsel %vm221_vm1, %v208_v58, %v209_v46  ;;  %v234_v39 = vsel %vm221_vm1, %v207_v25, %v208_v58  ;;  %v1591_v6 = vpack.i.bf16 %v231_v61, %v232_v63  ;;  %v212_v12 = vrot.slane %v1903_v34, 2 }
  0x99   :  { %1582 = vrot.lane.b32.xlu0 %v1581_v49, %s1761_s28  ;;  %v213_v14 = vrot.slane %v1910_v37, 2  ;;  %v1564_v15 = vunpack.i.l.bf16 %v1563_v57  ;;  %v1586_v16 = vpack.i.bf16 %v233_v1, %v234_v39  ;;  %v1601_v19 = vpack.i.bf16 %v194_v2, %v195_v51 }
  0x9a   :  { %1577 = vrot.lane.b32.xlu1 %v1576_v60, %s1763_s8  ;;  %v181_v20 = vrot.slane %v1934_v56, 1  ;;  %v182_v21 = vrot.slane %v1938_v59, 1  ;;  %v196_v22 = vsel %vm188_vm0, %v177_v53, %v178_v55  ;;  %v197_v23 = vsel %vm188_vm0, %v176_v29, %v177_v53 }
  0x9b   :  { %v217_v24 = vrot.slane %v1938_v59, 2  ;;  %v1965_v25 = vmax.f32 %v1842_v48, %v1565_v5  ;;  %v1968_v17 = vmax.f32 %v1856_v54, %v137_v11  ;;  %v229_v29 = vsel %vm221_vm1, %v212_v12, %v213_v14 }
  0x9c   :  { %v230_v48 = vsel %vm221_vm1, %v211_v52, %v212_v12  ;;  %v215_v35 = vrot.slane %v1899_v31, 2  ;;  %v216_v54 = vrot.slane %v1934_v56, 2  ;;  %v1984_v36 = vmax.f32 %v1840_v47, %v1564_v15 }
  0x9d   :  { %1592 = vrot.lane.b32.xlu0 %v1591_v6, %s1761_s28  ;;  %v1596_v40 = vpack.i.bf16 %v196_v22, %v197_v23  ;;  %v192_v38 = vsel %vm188_vm0, %v181_v20, %v182_v21  ;;  %v193_v18 = vsel %vm188_vm0, %v180_v43, %v181_v20  ;;  %v214_v41 = vrot.slane %v1896_v30, 2 }
  0x9e   :  { %1587 = vrot.lane.b32.xlu1 %v1586_v16, %s1761_s28  ;;  %v184_v32 = vrot.slane %v1965_v25, 1  ;;  %v1611_v47 = vpack.i.bf16 %v229_v29, %v230_v48  ;;  %v569_v42 = vsel %vm460_vm2, %v1706_v26, 0  ;;  %v462_v44 = vsel %vm460_vm2, %v1707_v28, 0 }
  0x9f   :  { %v185_v45 = vrot.slane %v1968_v17, 1  ;;  %v225_v46 = vsel %vm221_vm1, %v216_v54, %v217_v24  ;;  %v226_v43 = vsel %vm221_vm1, %v215_v35, %v216_v54  ;;  %1455 = vmatpush3.bf16.msra.mxu1 %v569_v42  ;;  %v2007_v49 = vsel %vm460_vm2, %v1708_v33, 0  ;;  %1441 = vmatpush3.bf16.msra.mxu0 %v462_v44 }
  0xa0   :  { %v1606_v50 = vpack.i.bf16 %v192_v38, %v193_v18  ;;  %v183_v52 = vrot.slane %v1984_v36, 1  ;;  %v227_v53 = vsel %vm221_vm1, %v214_v41, %v215_v35  ;;  %v228_v55 = vsel %vm221_vm1, %v213_v14, %v214_v41  ;;  %1520 = vmatprep.subr.msk.bf16.mxu0 %vm460_vm2, %v1708_v33 }
  0xa1   :  { %1602 = vrot.lane.b32.xlu0 %v1601_v19, %s1763_s8  ;;  %v1621_v57 = vpack.i.bf16 %v225_v46, %v226_v43  ;;  %v220_v58 = vrot.slane %v1968_v17, 2  ;;  %v189_v60 = vsel %vm188_vm0, %v184_v32, %v185_v45  ;;  %v204_v61 = vsel %vm188_vm0, %v185_v45, %v170_v7 }
  0xa2   :  { %1597 = vrot.lane.b32.xlu1 %v1596_v40, %s1763_s8  ;;  %v219_v63 = vrot.slane %v1965_v25, 2  ;;  %v1616_v1 = vpack.i.bf16 %v227_v53, %v228_v55  ;;  %v190_v39 = vsel %vm188_vm0, %v183_v52, %v184_v32  ;;  %v191_v2 = vsel %vm188_vm0, %v182_v21, %v183_v52 }
  0xa3   :  { %v218_v51 = vrot.slane %v1984_v36, 2  ;;  %v1631_v5 = vpack.i.bf16 %v204_v61, %v189_v60  ;;  %v237_v7 = vsel %vm221_vm1, %v220_v58, %v205_v27  ;;  %v1626_v11 = vpack.i.bf16 %v190_v39, %v191_v2 }
  0xa4   :  { %v222_v6 = vsel %vm221_vm1, %v219_v63, %v220_v58 }
  0xa5   :  { %1612 = vrot.lane.b32.xlu0 %v1611_v47, %s1761_s28  ;;  %v223_v12 = vsel %vm221_vm1, %v218_v51, %v219_v63  ;;  %v224_v14 = vsel %vm221_vm1, %v217_v24, %v218_v51  ;;  %v1641_v15 = vpack.i.bf16 %v237_v7, %v222_v6 }
  0xa6   :  { %1607 = vrot.lane.b32.xlu1 %v1606_v50, %s1763_s8  ;;  %v1636_v16 = vpack.i.bf16 %v223_v12, %v224_v14 }
  0xa9   :  { %1622 = vrot.lane.b32.xlu0 %v1621_v57, %s1761_s28 }
  0xaa   :  { %1617 = vrot.lane.b32.xlu1 %v1616_v1, %s1761_s28 }
  0xad   :  { %1632 = vrot.lane.b32.xlu0 %v1631_v5, %s1763_s8 }
  0xae   :  { %1627 = vrot.lane.b32.xlu1 %v1626_v11, %s1763_s8 }
  0xb1   :  { %1642 = vrot.lane.b32.xlu0 %v1641_v15, %s1761_s28 }
  0xb2   :  { %1637 = vrot.lane.b32.xlu1 %v1636_v16, %s1761_s28 }
 0x107   :  { %v1573_v19 = vpop.permute.xlu0 %1572 }
 0x108   :  { %v1568_v20 = vpop.permute.xlu1 %1567  ;;  %v1575_v33 = vunpack.i.h.bf16 %v1573_v19  ;;  %v1574_v38 = vunpack.i.l.bf16 %v1573_v19 }
 0x109   :  { %v1570_v27 = vunpack.i.h.bf16 %v1568_v20  ;;  %v1569_v21 = vunpack.i.l.bf16 %v1568_v20 }
 0x10a   :  { %v370_v50 = vsel %vm366_vm3, %v1874_v13, %v1575_v33  ;;  %v369_v52 = vsel %vm366_vm3, %v1876_v4, %v1574_v38 }
 0x10b   :  { %v1583_v22 = vpop.permute.xlu0 %1582  ;;  %v367_v24 = vsel %vm366_vm3, %v1866_v3, %v1569_v21  ;;  %v368_v29 = vsel %vm366_vm3, %v1863_v0, %v1570_v27 }
 0x10c   :  { %v1585_v23 = vunpack.i.h.bf16 %v1583_v22  ;;  %v1584_v26 = vunpack.i.l.bf16 %v1583_v22  ;;  %v1578_v28 = vpop.permute.xlu1 %1577 }
 0x10d   :  { %v1580_v48 = vunpack.i.h.bf16 %v1578_v28  ;;  %v1579_v35 = vunpack.i.l.bf16 %v1578_v28 }
 0x10e   :  { %v384_v54 = vsel %vm383_vm4, %v367_v24, %v1584_v26  ;;  %v385_v40 = vsel %vm383_vm4, %v368_v29, %v1585_v23 }
 0x10f   :  { %v1593_v18 = vpop.permute.xlu0 %1592  ;;  %v400_v41 = vpack.c.bf16 %v385_v40, %v384_v54  ;;  %v372_v42 = vsel %vm366_vm3, %v1869_v8, %v1580_v48  ;;  %v371_v3 = vsel %vm366_vm3, %v1861_v62, %v1579_v35 }
 0x110   :  { %v1595_v32 = vunpack.i.h.bf16 %v1593_v18  ;;  %v1594_v47 = vunpack.i.l.bf16 %v1593_v18  ;;  %v1588_v0 = vpop.permute.xlu1 %1587 }
 0x111   :  { %1456 = vmatprep.mubr.msk.bf16.mxu1 %vm441_vm5, %v400_v41  ;;  %v1590_v46 = vunpack.i.h.bf16 %v1588_v0  ;;  %v1589_v43 = vunpack.i.l.bf16 %v1588_v0  ;;  %v419_v1 = vrot.slane %v400_v41, 4 }
 0x112   :  { %v388_v44 = vsel %vm383_vm4, %v371_v3, %v1594_v47  ;;  %v389_v45 = vsel %vm383_vm4, %v372_v42, %v1595_v32 }
 0x113   :  { %v2063_v53 = vpack.c.bf16 %v389_v45, %v388_v44  ;;  %v1603_v8 = vpop.permute.xlu0 %1602  ;;  %v387_v62 = vsel %vm383_vm4, %v370_v50, %v1590_v46  ;;  %v386_v55 = vsel %vm383_vm4, %v369_v52, %v1589_v43 }
 0x114   :  { %v2067_v57 = vpack.c.bf16 %v387_v62, %v386_v55  ;;  %v1598_v58 = vpop.permute.xlu1 %1597  ;;  %v1605_v19 = vunpack.i.h.bf16 %v1603_v8  ;;  %v1604_v20 = vunpack.i.l.bf16 %v1603_v8 }
 0x115   :  { %v422_v60 = vrot.slane %v2063_v53, 4  ;;  %v1600_v61 = vunpack.i.h.bf16 %v1598_v58  ;;  %v1599_v63 = vunpack.i.l.bf16 %v1598_v58 }
 0x116   :  { %1457 = vmatmul.mubr.msk.bf16.vlgmr.msra.gmra.mxu1 %vm441_vm5, %v2067_v57  ;;  %v420_v4 = vrot.slane %v2067_v57, 4  ;;  %v376_v54 = vsel %vm366_vm3, %v1896_v30, %v1605_v19 }
 0x117   :  { %v1613_v13 = vpop.permute.xlu0 %1612  ;;  %1460 = vmatprep.mubr.msk.bf16.mxu1 %vm441_vm5, %v2063_v53  ;;  %v374_v51 = vsel %vm366_vm3, %v1903_v34, %v1600_v61  ;;  %v373_v5 = vsel %vm366_vm3, %v1880_v10, %v1599_v63 }
 0x118   :  { %v1615_v39 = vunpack.i.h.bf16 %v1613_v13  ;;  %v1614_v2 = vunpack.i.l.bf16 %v1613_v13  ;;  %v1608_v6 = vpop.permute.xlu1 %1607  ;;  %v421_v7 = vsel %vm418_vm6, %v419_v1, %v420_v4  ;;  %v423_v11 = vsel %vm418_vm6, %v420_v4, %v422_v60 }
 0x119   :  { %v1610_v15 = vunpack.i.h.bf16 %v1608_v6  ;;  %v1609_v16 = vunpack.i.l.bf16 %v1608_v6  ;;  %1442 = vmatprep.mubr.msk.bf16.mxu0 %vm441_vm5, %v421_v7 }
 0x11a   :  { %v390_v12 = vsel %vm383_vm4, %v373_v5, %v1614_v2  ;;  %v391_v14 = vsel %vm383_vm4, %v374_v51, %v1615_v39  ;;  %1443 = vmatmul.mubr.msk.bf16.vlgmr.msra.gmra.mxu0 %vm441_vm5, %v423_v11 }
 0x11b   :  { %v403_v27 = vpack.c.bf16 %v391_v14, %v390_v12  ;;  %v1623_v34 = vpop.permute.xlu0 %1622  ;;  %1469 = vmatpush3.bf16.msra.mxu0 %v2007_v49  ;;  %v378_v22 = vsel %vm366_vm3, %v1934_v56, %v1610_v15  ;;  %v377_v23 = vsel %vm366_vm3, %v1899_v31, %v1609_v16  ;;  %v375_v49 = vsel %vm366_vm3, %v1910_v37, %v1604_v20 }
 0x11c   :  { %v1625_v10 = vunpack.i.h.bf16 %v1623_v34  ;;  %v1624_v21 = vunpack.i.l.bf16 %v1623_v34  ;;  %v1618_v26 = vpop.permute.xlu1 %1617 }
 0x11d   :  { %v424_v28 = vrot.slane %v403_v27, 4  ;;  %v1620_v48 = vunpack.i.h.bf16 %v1618_v26  ;;  %v1619_v35 = vunpack.i.l.bf16 %v1618_v26 }
 0x11e   :  { %v394_v24 = vsel %vm383_vm4, %v377_v23, %v1624_v21  ;;  %v395_v29 = vsel %vm383_vm4, %v378_v22, %v1625_v10 }
 0x11f   :  { %v405_v40 = vpack.c.bf16 %v395_v29, %v394_v24  ;;  %v1633_v33 = vpop.permute.xlu0 %1632  ;;  %v425_v56 = vsel %vm418_vm6, %v422_v60, %v424_v28  ;;  %v393_v31 = vsel %vm383_vm4, %v376_v54, %v1620_v48  ;;  %v392_v38 = vsel %vm383_vm4, %v375_v49, %v1619_v35  ;;  %v2137_v48 = vld [vmem:[%s2381_s2] ss:$0 sm:$0xff] }
 0x120   :  { %1446 = vmatprep.mubr.msk.bf16.mxu0 %vm441_vm5, %v425_v56  ;;  %v404_v18 = vpack.c.bf16 %v393_v31, %v392_v38  ;;  %v1635_v41 = vunpack.i.h.bf16 %v1633_v33  ;;  %v1634_v32 = vunpack.i.l.bf16 %v1633_v33  ;;  %v1628_v47 = vpop.permute.xlu1 %1627  ;;  %v2142_v49 = vld [vmem:[%s2382_s3] ss:$0 sm:$0xff] }
 0x121   :  { %v427_v42 = vrot.slane %v405_v40, 4  ;;  %v1630_v3 = vunpack.i.h.bf16 %v1628_v47  ;;  %v1629_v30 = vunpack.i.l.bf16 %v1628_v47 }
 0x122   :  { %1461 = vmatmul.mubr.msk.bf16.gmra.mxu1 %vm441_vm5, %v404_v18  ;;  %v426_v0 = vrot.slane %v404_v18, 4  ;;  %v382_v46 = vsel %vm366_vm3, %v1968_v17, %v1635_v41  ;;  %v381_v43 = vsel %vm366_vm3, %v1965_v25, %v1634_v32 }
 0x123   :  { %v1643_v37 = vpop.permute.xlu0 %1642  ;;  %1464 = vmatprep.mubr.msk.bf16.mxu1 %vm441_vm5, %v405_v40  ;;  %v380_v60 = vsel %vm366_vm3, %v1984_v36, %v1630_v3  ;;  %v379_v17 = vsel %vm366_vm3, %v1938_v59, %v1629_v30  ;;  %v1709_v59 = vld [vmem:[%s2383_s4 + $0x14] ss:$0 sps:$4 sm:$0xff]  }
 0x124   :  { %v1645_v44 = vunpack.i.h.bf16 %v1643_v37  ;;  %v1644_v45 = vunpack.i.l.bf16 %v1643_v37  ;;  %v1638_v50 = vpop.permute.xlu1 %1637  ;;  %v428_v52 = vsel %vm418_vm6, %v426_v0, %v427_v42  ;;  %1521 = vmatprep.subr.msk.bf16.mxu1 %vm418_vm6, %v1709_v59  ;;  %v1034_v36 = vsel %vm418_vm6, %v1709_v59, 0 }
 0x125   :  { %v1640_v55 = vunpack.i.h.bf16 %v1638_v50  ;;  %v1639_v58 = vunpack.i.l.bf16 %v1638_v50  ;;  %1447 = vmatmul.mubr.msk.bf16.gmra.mxu0 %vm441_vm5, %v428_v52  ;;  %1483 = vmatpush3.bf16.msra.mxu1 %v1034_v36 }
 0x126   :  { %v398_v8 = vsel %vm383_vm4, %v381_v43, %v1644_v45  ;;  %v399_v62 = vsel %vm383_vm4, %v382_v46, %v1645_v44 }
 0x127   :  { %v407_v61 = vpack.c.bf16 %v399_v62, %v398_v8  ;;  %v396_v25 = vsel %vm383_vm4, %v379_v17, %v1639_v58  ;;  %v397_v63 = vsel %vm383_vm4, %v380_v60, %v1640_v55 }
 0x128   :  { %v406_v1 = vpack.c.bf16 %v397_v63, %v396_v25 }
 0x129   :  { %v431_v13 = vrot.slane %v407_v61, 4 }
 0x12a   :  { %1465 = vmatmul.mubr.msk.bf16.gmra.mxu1 %vm441_vm5, %v406_v1  ;;  %v429_v4 = vrot.slane %v406_v1, 4 }
 0x12c   :  { %v430_v39 = vsel %vm418_vm6, %v427_v42, %v429_v4  ;;  %v432_v2 = vsel %vm418_vm6, %v429_v4, %v431_v13 }
 0x12d   :  { %1450 = vmatprep.mubr.msk.bf16.mxu0 %vm441_vm5, %v430_v39 }
 0x12e   :  { %1451 = vmatmul.mubr.msk.bf16.gmra.mxu0 %vm441_vm5, %v432_v2 }
 0x12f   :  { %1470 = vmatprep.mubr.msk.bf16.mxu0 %vm441_vm5, %v2067_v57 }
 0x136   :  { %1471 = vmatmul.mubr.msk.bf16.vlgmr.msra.gmra.mxu0 %vm441_vm5, %v2063_v53 }
 0x137   :  { %1474 = vmatprep.mubr.msk.bf16.mxu0 %vm441_vm5, %v403_v27 }
 0x13e   :  { %1475 = vmatmul.mubr.msk.bf16.gmra.mxu0 %vm441_vm5, %v405_v40 }
 0x13f   :  { %1478 = vmatprep.mubr.msk.bf16.mxu0 %vm441_vm5, %v406_v1 }
 0x146   :  { %1479 = vmatmul.mubr.msk.bf16.gmra.mxu0 %vm441_vm5, %v407_v61 }
 0x1d6   :  { %v1458_v57 = vpop.f32.mrf.mxu1 }
 0x1d8   :  { %v605_v53 = vpop.f32.mrf.mxu1 }
 0x1da   :  { %v1444_v51 = vpop.f32.mrf.mxu0  ;;  %v1459_v6 = vpop.f32.mrf.mxu1 }
 0x1db   :  { %v614_v28 = vadd.f32 %v1458_v57, %v1444_v51 }
 0x1dc   :  { %v498_v5 = vpop.f32.mrf.mxu0  ;;  %v608_v11 = vpop.f32.mrf.mxu1 }
 0x1dd   :  { %v606_v35 = vadd.f32 %v605_v53, %v498_v5 }
 0x1de   :  { %v1445_v7 = vpop.f32.mrf.mxu0 }
 0x1df   :  { %v617_v33 = vadd.f32 %v1459_v6, %v1445_v7 }
 0x1e0   :  { %v501_v12 = vpop.f32.mrf.mxu0 }
 0x1e1   :  { %v609_v41 = vadd.f32 %v608_v11, %v501_v12 }
 0x1e2   :  { %v1462_v14 = vpop.f32.mrf.mxu1 }
 0x1e4   :  { %v621_v19 = vpop.f32.mrf.mxu1 }
 0x1e5   :  { %v1448_v15 = vpop.f32.mrf.mxu0 }
 0x1e6   :  { %v1463_v34 = vpop.f32.mrf.mxu1  ;;  %v630_v30 = vadd.f32 %v1462_v14, %v1448_v15 }
 0x1e7   :  { %v514_v16 = vpop.f32.mrf.mxu0 }
 0x1e8   :  { %v624_v22 = vpop.f32.mrf.mxu1  ;;  %v622_v46 = vadd.f32 %v621_v19, %v514_v16 }
 0x1e9   :  { %v1449_v20 = vpop.f32.mrf.mxu0 }
 0x1ea   :  { %v1466_v24 = vpop.f32.mrf.mxu1  ;;  %v633_v52 = vadd.f32 %v1463_v34, %v1449_v20 }
 0x1eb   :  { %v517_v27 = vpop.f32.mrf.mxu0 }
 0x1ec   :  { %v637_v56 = vpop.f32.mrf.mxu1  ;;  %v625_v58 = vadd.f32 %v624_v22, %v517_v27 }
 0x1ee   :  { %v1452_v10 = vpop.f32.mrf.mxu0  ;;  %v1467_v37 = vpop.f32.mrf.mxu1 }
 0x1ef   :  { %v646_v60 = vadd.f32 %v1466_v24, %v1452_v10 }
 0x1f0   :  { %v530_v21 = vpop.f32.mrf.mxu0  ;;  %v640_v63 = vpop.f32.mrf.mxu1 }
 0x1f1   :  { %v638_v17 = vadd.f32 %v637_v56, %v530_v21 }
 0x1f2   :  { %v1453_v23 = vpop.f32.mrf.mxu0 }
 0x1f3   :  { %v649_v2 = vadd.f32 %v1467_v37, %v1453_v23 }
 0x1f4   :  { %v533_v26 = vpop.f32.mrf.mxu0 }
 0x1f5   :  { %v641_v59 = vadd.f32 %v640_v63, %v533_v26 }
 0x1f6   :  { %v1472_v29 = vpop.f32.mrf.mxu0 }
 0x1f7   :  { %v752_v54 = vadd.f32 %v1472_v29, %v614_v28  ;;  %v2182_v28 = vld [vmem:[%s2383_s4 + $0x20] ss:$0 sps:$4 sm:$0xff]  }
 0x1f8   :  { %v703_v40 = vpop.f32.mrf.mxu0  ;;  %1523 = vmatprep.subr.msk.bf16.mxu0 %vm418_vm6, %v2182_v28 }
 0x1f9   :  { %v771_v31 = vmul.f32 %v2137_v48, %v752_v54  ;;  %v750_v38 = vadd.f32 %v703_v40, %v606_v35 }
 0x1fa   :  { %v1473_v18 = vpop.f32.mrf.mxu0 }
 0x1fb   :  { %v790_v32 = vadd.f32 %v2142_v49, %v771_v31  ;;  %v769_v47 = vmul.f32 %v2137_v48, %v750_v38  ;;  %v753_v42 = vadd.f32 %v1473_v18, %v617_v33 }
 0x1fc   :  { %v706_v3 = vpop.f32.mrf.mxu0 }
 0x1fd   :  { %v788_v0 = vadd.f32 %v2142_v49, %v769_v47  ;;  %v772_v44 = vmul.f32 %v2137_v48, %v753_v42  ;;  %v751_v45 = vadd.f32 %v706_v3, %v609_v41  ;;  %v2149_v43 = vmax.f32 %v790_v32, 0.0 }
 0x1fe   :  { %v1476_v50 = vpop.f32.mrf.mxu0 }
 0x1ff   :  { %v791_v8 = vadd.f32 %v2142_v49, %v772_v44  ;;  %v770_v62 = vmul.f32 %v2137_v48, %v751_v45  ;;  %v756_v55 = vadd.f32 %v1476_v50, %v630_v30  ;;  %v2153_v61 = vmax.f32 %v788_v0, 0.0 }
 0x200   :  { %v719_v25 = vpop.f32.mrf.mxu0  ;;  %v838_v57 = vrot.slane %v2149_v43, 2  ;;  %v814_v51 = vrot.slane %v2149_v43, 1 }
 0x201   :  { %v2155_v1 = vmax.f32 %v791_v8, 0.0  ;;  %v789_v13 = vadd.f32 %v2142_v49, %v770_v62  ;;  %v775_v4 = vmul.f32 %v2137_v48, %v756_v55  ;;  %v754_v39 = vadd.f32 %v719_v25, %v622_v46 }
 0x202   :  { %v1477_v36 = vpop.f32.mrf.mxu0  ;;  %v836_v12 = vrot.slane %v2153_v61, 2  ;;  %v812_v14 = vrot.slane %v2153_v61, 1 }
 0x203   :  { %v2161_v53 = vmax.f32 %v789_v13, 0.0  ;;  %v794_v5 = vadd.f32 %v2142_v49, %v775_v4  ;;  %v773_v6 = vmul.f32 %v2137_v48, %v754_v39  ;;  %v757_v7 = vadd.f32 %v1477_v36, %v633_v52  ;;  %v1711_v13 = vld [vmem:[%s2383_s4 + $0xc] sm:$0xff]  }
 0x204   :  { %v722_v11 = vpop.f32.mrf.mxu0  ;;  %v839_v15 = vrot.slane %v2155_v1, 2  ;;  %v815_v16 = vrot.slane %v2155_v1, 1  ;;  %1484 = vmatprep.subr.bf16.mxu1 %v1711_v13 }
 0x205   :  { %v2169_v19 = vmax.f32 %v794_v5, 0.0  ;;  %v792_v20 = vadd.f32 %v2142_v49, %v773_v6  ;;  %v776_v27 = vmul.f32 %v2137_v48, %v757_v7  ;;  %v755_v34 = vadd.f32 %v722_v11, %v625_v58  ;;  %1485 = vmatpush3.bf16.msra.mxu1 %v1711_v13 }
 0x206   :  { %v1480_v10 = vpop.f32.mrf.mxu0  ;;  %v837_v21 = vrot.slane %v2161_v53, 2  ;;  %v813_v22 = vrot.slane %v2161_v53, 1  ;;  %v856_v23 = vsel %vm221_vm1, %v838_v57, %v839_v15  ;;  %v832_v26 = vsel %vm188_vm0, %v814_v51, %v815_v16 }
 0x207   :  { %v2184_v24 = vmax.f32 %v792_v20, 0.0  ;;  %v795_v29 = vadd.f32 %v2142_v49, %v776_v27  ;;  %v774_v35 = vmul.f32 %v2137_v48, %v755_v34  ;;  %v760_v54 = vadd.f32 %v1480_v10, %v646_v60 }
 0x208   :  { %v735_v40 = vpop.f32.mrf.mxu0  ;;  %v857_v33 = vsel %vm221_vm1, %v837_v21, %v838_v57  ;;  %v858_v56 = vsel %vm221_vm1, %v836_v12, %v837_v21  ;;  %v833_v31 = vsel %vm188_vm0, %v813_v22, %v814_v51  ;;  %v834_v38 = vsel %vm188_vm0, %v812_v14, %v813_v22 }
 0x209   :  { %v2202_v18 = vmax.f32 %v795_v29, 0.0  ;;  %v793_v41 = vadd.f32 %v2142_v49, %v774_v35  ;;  %v779_v32 = vmul.f32 %v2137_v48, %v760_v54  ;;  %v758_v47 = vadd.f32 %v735_v40, %v638_v17 }
 0x20a   :  { %v1651_v42 = vpack.i.bf16 %v857_v33, %v858_v56  ;;  %v1646_v3 = vpack.i.bf16 %v833_v31, %v834_v38  ;;  %v1481_v30 = vpop.f32.mrf.mxu0  ;;  %v840_v37 = vrot.slane %v2184_v24, 2  ;;  %v816_v0 = vrot.slane %v2184_v24, 1  ;;  %v1712_v38 = vld [vmem:[%s2383_s4 + $0x18] sm:$0xff]  }
 0x20b   :  { %v2208_v44 = vmax.f32 %v793_v41, 0.0  ;;  %v798_v45 = vadd.f32 %v2142_v49, %v779_v32  ;;  %v777_v46 = vmul.f32 %v2137_v48, %v758_v47  ;;  %v761_v50 = vadd.f32 %v1481_v30, %v649_v2  ;;  %v2272_v41 = vld [vmem:[%s2383_s4 + $0x8] ss:$0 sps:$4 sm:$0xff]  }
 0x20c   :  { %1652 = vrot.lane.b32.xlu0 %v1651_v42, %s1764_s20  ;;  %1647 = vrot.lane.b32.xlu1 %v1646_v3, %s1761_s28  ;;  %v738_v52 = vpop.f32.mrf.mxu0  ;;  %v855_v8 = vsel %vm221_vm1, %v839_v15, %v840_v37  ;;  %v831_v62 = vsel %vm188_vm0, %v815_v16, %v816_v0  ;;  %v842_v55 = vrot.slane %v2169_v19, 2  ;;  %v818_v58 = vrot.slane %v2169_v19, 1 }
 0x20d   :  { %v2220_v60 = vmax.f32 %v798_v45, 0.0  ;;  %v796_v17 = vadd.f32 %v2142_v49, %v777_v46  ;;  %v780_v25 = vmul.f32 %v2137_v48, %v761_v50  ;;  %v759_v63 = vadd.f32 %v738_v52, %v641_v59  ;;  %1522 = vmatprep.subr.msk.bf16.mxu1 %vm418_vm6, %v2272_v41 }
 0x20e   :  { %v1661_v4 = vpack.i.bf16 %v855_v8, %v856_v23  ;;  %v1656_v39 = vpack.i.bf16 %v831_v62, %v832_v26  ;;  %v841_v2 = vrot.slane %v2208_v44, 2  ;;  %v817_v36 = vrot.slane %v2208_v44, 1 }
 0x20f   :  { %v2229_v57 = vmax.f32 %v796_v17, 0.0  ;;  %v799_v51 = vadd.f32 %v2142_v49, %v780_v25  ;;  %v778_v5 = vmul.f32 %v2137_v48, %v759_v63  ;;  %v843_v6 = vrot.slane %v2202_v18, 2 }
 0x210   :  { %1662 = vrot.lane.b32.xlu1 %v1661_v4, %s1764_s20  ;;  %1657 = vrot.lane.b32.xlu0 %v1656_v39, %s1761_s28  ;;  %v853_v59 = vsel %vm221_vm1, %v841_v2, %v842_v55  ;;  %v854_v7 = vsel %vm221_vm1, %v840_v37, %v841_v2  ;;  %v829_v11 = vsel %vm188_vm0, %v817_v36, %v818_v58  ;;  %v819_v15 = vrot.slane %v2202_v18, 1 }
 0x211   :  { %v2243_v16 = vmax.f32 %v799_v51, 0.0  ;;  %v797_v48 = vadd.f32 %v2142_v49, %v778_v5  ;;  %v1671_v20 = vpack.i.bf16 %v853_v59, %v854_v7  ;;  %v830_v27 = vsel %vm188_vm0, %v816_v0, %v817_v36 }
 0x212   :  { %v1666_v34 = vpack.i.bf16 %v829_v11, %v830_v27  ;;  %v844_v10 = vrot.slane %v2229_v57, 2  ;;  %v820_v21 = vrot.slane %v2229_v57, 1  ;;  %v852_v23 = vsel %vm221_vm1, %v842_v55, %v843_v6 }
 0x213   :  { %v2250_v22 = vmax.f32 %v797_v48, 0.0  ;;  %v823_v26 = vrot.slane %v2243_v16, 1  ;;  %v828_v35 = vsel %vm188_vm0, %v818_v58, %v819_v15  ;;  %v822_v33 = vrot.slane %v2220_v60, 1 }
 0x214   :  { %1672 = vrot.lane.b32.xlu0 %v1671_v20, %s1764_s20  ;;  %1667 = vrot.lane.b32.xlu1 %v1666_v34, %s1761_s28  ;;  %v851_v49 = vsel %vm221_vm1, %v843_v6, %v844_v10  ;;  %v827_v29 = vsel %vm188_vm0, %v819_v15, %v820_v21  ;;  %v847_v31 = vrot.slane %v2243_v16, 2  ;;  %v1210_v3 = vsel %vm418_vm6, %v2182_v28, 0 }
 0x215   :  { %v1681_v54 = vpack.i.bf16 %v851_v49, %v852_v23  ;;  %v1676_v40 = vpack.i.bf16 %v827_v29, %v828_v35  ;;  %v821_v56 = vrot.slane %v2250_v22, 1  ;;  %v824_v32 = vsel %vm188_vm0, %v822_v33, %v823_v26  ;;  %1507 = vmatpush3.bf16.msra.mxu0 %v1210_v3 }
 0x216   :  { %v835_v47 = vsel %vm188_vm0, %v823_v26, %v812_v14  ;;  %v845_v42 = vrot.slane %v2250_v22, 2  ;;  %v846_v45 = vrot.slane %v2220_v60, 2  ;;  %1508 = vmatprep.subr.bf16.mxu0 %v1712_v38  ;;  %v859_v52 = vsel %vm221_vm1, %v847_v31, %v836_v12 }
 0x217   :  { %v825_v30 = vsel %vm188_vm0, %v821_v56, %v822_v33  ;;  %v826_v37 = vsel %vm188_vm0, %v820_v21, %v821_v56  ;;  %v1686_v14 = vpack.i.bf16 %v835_v47, %v824_v32 }
 0x218   :  { %1682 = vrot.lane.b32.xlu0 %v1681_v54, %s1764_s20  ;;  %1677 = vrot.lane.b32.xlu1 %v1676_v40, %s1761_s28  ;;  %v1691_v0 = vpack.i.bf16 %v825_v30, %v826_v37  ;;  %v849_v28 = vsel %vm221_vm1, %v845_v42, %v846_v45  ;;  %v850_v46 = vsel %vm221_vm1, %v844_v10, %v845_v42 }
 0x219   :  { %v848_v50 = vsel %vm221_vm1, %v846_v45, %v847_v31  ;;  %1509 = vmatpush3.bf16.msra.mxu0 %v1712_v38  ;;  %v1696_v8 = vpack.i.bf16 %v849_v28, %v850_v46 }
 0x21a   :  { %v1701_v62 = vpack.i.bf16 %v859_v52, %v848_v50 }
 0x21c   :  { %1687 = vrot.lane.b32.xlu1 %v1686_v14, %s1761_s28  ;;  %1692 = vrot.lane.b32.xlu0 %v1691_v0, %s1761_s28  ;;  %v1123_v14 = vsel %vm418_vm6, %v2272_v41, 0 }
 0x220   :  { %1697 = vrot.lane.b32.xlu1 %v1696_v8, %s1764_s20  ;;  %1702 = vrot.lane.b32.xlu0 %v1701_v62, %s1764_s20 }
 0x27e   :  { %v1653_v55 = vpop.permute.xlu0 %1652  ;;  %v1648_v58 = vpop.permute.xlu1 %1647 }
 0x27f   :  { %v1650_v17 = vunpack.i.h.bf16 %v1648_v58  ;;  %v1649_v25 = vunpack.i.l.bf16 %v1648_v58  ;;  %v1655_v63 = vunpack.i.h.bf16 %v1653_v55  ;;  %v1654_v13 = vunpack.i.l.bf16 %v1653_v55 }
 0x281   :  { %v957_v9 = vsel %vm383_vm4, %v2161_v53, %v1650_v17  ;;  %v956_v12 = vsel %vm383_vm4, %v2153_v61, %v1649_v25 }
 0x282   :  { %v1663_v4 = vpop.permute.xlu1 %1662  ;;  %v1658_v39 = vpop.permute.xlu0 %1657  ;;  %v970_v6 = vsel %vm968_vm7, %v957_v9, %v1655_v63  ;;  %v969_v59 = vsel %vm968_vm7, %v956_v12, %v1654_v13 }
 0x283   :  { %v1665_v2 = vunpack.i.h.bf16 %v1663_v4  ;;  %v1660_v36 = vunpack.i.h.bf16 %v1658_v39  ;;  %v1664_v51 = vunpack.i.l.bf16 %v1663_v4  ;;  %v1659_v5 = vunpack.i.l.bf16 %v1658_v39 }
 0x284   :  { %v2317_v10 = vpack.c.bf16 %v970_v6, %v969_v59 }
 0x285   :  { %v959_v7 = vsel %vm383_vm4, %v2155_v1, %v1660_v36  ;;  %v958_v11 = vsel %vm383_vm4, %v2149_v43, %v1659_v5 }
 0x286   :  { %v1673_v53 = vpop.permute.xlu0 %1672  ;;  %v1668_v15 = vpop.permute.xlu1 %1667  ;;  %v972_v61 = vsel %vm968_vm7, %v959_v7, %v1665_v2  ;;  %v971_v21 = vsel %vm968_vm7, %v958_v11, %v1664_v51  ;;  %v996_v38 = vrot.slane %v2317_v10, 4 }
 0x287   :  { %v1675_v48 = vunpack.i.h.bf16 %v1673_v53  ;;  %v1674_v20 = vunpack.i.l.bf16 %v1673_v53  ;;  %v1670_v27 = vunpack.i.h.bf16 %v1668_v15  ;;  %v1669_v34 = vunpack.i.l.bf16 %v1668_v15 }
 0x288   :  { %v982_v43 = vpack.c.bf16 %v972_v61, %v971_v21 }
 0x289   :  { %v961_v23 = vsel %vm383_vm4, %v2208_v44, %v1670_v27  ;;  %v960_v1 = vsel %vm383_vm4, %v2184_v24, %v1669_v34 }
 0x28a   :  { %v974_v26 = vsel %vm968_vm7, %v961_v23, %v1675_v48  ;;  %v973_v49 = vsel %vm968_vm7, %v960_v1, %v1674_v20  ;;  %v1683_v29 = vpop.permute.xlu0 %1682  ;;  %v1678_v35 = vpop.permute.xlu1 %1677  ;;  %1510 = vmatprep.mubr.msk.bf16.mxu0 %vm1019_vm8, %v982_v43  ;;  %v997_v44 = vrot.slane %v982_v43, 4  ;;  %v1399_v1 = vld [vmem:[%s2384_s5] ss:$0 sm:$0xff]  ;;  %s1765_s5 = smov [#allocation5]  }
 0x28b   :  { %v983_v54 = vpack.c.bf16 %v974_v26, %v973_v49  ;;  %v1685_v40 = vunpack.i.h.bf16 %v1683_v29  ;;  %v1684_v33 = vunpack.i.l.bf16 %v1683_v29  ;;  %v1680_v56 = vunpack.i.h.bf16 %v1678_v35 }
 0x28c   :  { %v1679_v31 = vunpack.i.l.bf16 %v1678_v35  ;;  %v998_v42 = vsel %vm418_vm6, %v996_v38, %v997_v44  ;;  %v1400_v35 = vld [vmem:[%s2385_s6] ss:$0 sm:$0xff]  ;;  %s1336_s6 = sshll.u32 %s1765_s5, 4  ;;  %s1337_s6 = int_to_ptr.vmem [resolvable:$true] %s1336_s6 }
 0x28d   :  { %v999_v32 = vrot.slane %v983_v54, 4  ;;  %v963_v24 = vsel %vm383_vm4, %v2202_v18, %v1680_v56  ;;  %1511 = vmatmul.mubr.msk.bf16.vlgmr.msra.gmra.mxu0 %vm1019_vm8, %v983_v54  ;;  %1486 = vmatprep.mubr.msk.bf16.mxu1 %vm1019_vm8, %v998_v42  ;;  %v1714_v18 = vld [vmem:[%s2383_s4] sm:$0xff]   ;;  %s1735_s10 = scalar_lea.vmem %s1337_s6, 1024  ;;  %p1740_p6 = scmp.lt.s32.totalorder %s1337_s6, %s1337_s6 }
 0x28e   :  { %v962_v47 = vsel %vm383_vm4, %v2169_v19, %v1679_v31  ;;  %v1688_v3 = vpop.permute.xlu1 %1687  ;;  %v1693_v30 = vpop.permute.xlu0 %1692  ;;  %v976_v37 = vsel %vm968_vm7, %v963_v24, %v1685_v40  ;;  %p1736_p5 = scmp.ne.s32.totalorder %s1337_s6, %s1735_s10  ;;  %p1741_p7 = scmp.lt.s32.totalorder %s1735_s10, %s1735_s10 }
 0x28f   :  { %v975_v0 = vsel %vm968_vm7, %v962_v47, %v1684_v33  ;;  %v1690_v45 = vunpack.i.h.bf16 %v1688_v3  ;;  %v1689_v28 = vunpack.i.l.bf16 %v1688_v3  ;;  %v1695_v19 = vunpack.i.h.bf16 %v1693_v30 }
 0x290   :  { %v1694_v46 = vunpack.i.l.bf16 %v1693_v30  ;;  %v1000_v50 = vsel %vm418_vm6, %v997_v44, %v999_v32  ;;  %v984_v52 = vpack.c.bf16 %v976_v37, %v975_v0  ;;  %p1742_p8 = por %p1741_p7, %p1740_p6 }
 0x291   :  { %1487 = vmatmul.mubr.msk.bf16.vlgmr.msra.gmra.mxu1 %vm1019_vm8, %v1000_v50  ;;  %v967_v41 = vsel %vm383_vm4, %v2243_v16, %v1690_v45  ;;  %v966_v63 = vsel %vm383_vm4, %v2220_v60, %v1689_v28  ;;  %v965_v13 = vsel %vm383_vm4, %v2250_v22, %v1695_v19 }
 0x292   :  { %v1698_v8 = vpop.permute.xlu1 %1697  ;;  %v1703_v62 = vpop.permute.xlu0 %1702  ;;  %1495 = vmatpush3.bf16.msra.mxu1 %v1123_v14  ;;  %v964_v9 = vsel %vm383_vm4, %v2229_v57, %v1694_v46  ;;  %v1001_v60 = vrot.slane %v984_v52, 4  ;;  %p1743_p9 = pnand %p1742_p8, %p1736_p5 }
 0x293   :  { %v1700_v55 = vunpack.i.h.bf16 %v1698_v8  ;;  %v1699_v58 = vunpack.i.l.bf16 %v1698_v8  ;;  %v1705_v17 = vunpack.i.h.bf16 %v1703_v62  ;;  %v1704_v25 = vunpack.i.l.bf16 %v1703_v62  ;;  %1496 = vmatprep.subr.bf16.mxu1 %v1714_v18 }
 0x295   :  { %v977_v12 = vsel %vm968_vm7, %v964_v9, %v1699_v58  ;;  %v978_v4 = vsel %vm968_vm7, %v965_v13, %v1700_v55  ;;  %v980_v39 = vsel %vm968_vm7, %v967_v41, %v1705_v17  ;;  %v979_v2 = vsel %vm968_vm7, %v966_v63, %v1704_v25 }
 0x296   :  { %v985_v36 = vpack.c.bf16 %v978_v4, %v977_v12  ;;  %v986_v51 = vpack.c.bf16 %v980_v39, %v979_v2  ;;  %1497 = vmatpush3.bf16.msra.mxu1 %v1714_v18 }
 0x298   :  { %1514 = vmatprep.mubr.msk.bf16.mxu0 %vm1019_vm8, %v985_v36  ;;  %v1002_v16 = vrot.slane %v985_v36, 4  ;;  %v1004_v5 = vrot.slane %v986_v51, 4 }
 0x299   :  { %1515 = vmatmul.mubr.msk.bf16.gmra.mxu0 %vm1019_vm8, %v986_v51 }
 0x29a   :  { %v1003_v57 = vsel %vm418_vm6, %v1001_v60, %v1002_v16  ;;  %v1005_v22 = vsel %vm418_vm6, %v1002_v16, %v1004_v5 }
 0x29b   :  { %1490 = vmatprep.mubr.msk.bf16.mxu1 %vm1019_vm8, %v1003_v57 }
 0x29c   :  { %1491 = vmatmul.mubr.msk.bf16.gmra.mxu1 %vm1019_vm8, %v1005_v22 }
 0x29d   :  { %1498 = vmatprep.mubr.msk.bf16.mxu1 %vm1019_vm8, %v2317_v10 }
 0x2a4   :  { %1499 = vmatmul.mubr.msk.bf16.vlgmr.msra.gmra.mxu1 %vm1019_vm8, %v982_v43 }
 0x2a5   :  { %1502 = vmatprep.mubr.msk.bf16.mxu1 %vm1019_vm8, %v984_v52 }
 0x2ac   :  { %1503 = vmatmul.mubr.msk.bf16.gmra.mxu1 %vm1019_vm8, %v985_v36 }
 0x34d   :  { %v1512_v11 = vpop.f32.mrf.mxu0 }
 0x34f   :  { %v1246_v61 = vpop.f32.mrf.mxu0 }
 0x351   :  { %v1488_v6 = vpop.f32.mrf.mxu1  ;;  %v1513_v27 = vpop.f32.mrf.mxu0 }
 0x353   :  { %v1070_v59 = vpop.f32.mrf.mxu1  ;;  %v1249_v10 = vpop.f32.mrf.mxu0 }
 0x355   :  { %v1489_v7 = vpop.f32.mrf.mxu1 }
 0x357   :  { %v1073_v53 = vpop.f32.mrf.mxu1 }
 0x359   :  { %v1516_v29 = vpop.f32.mrf.mxu0 }
 0x35b   :  { %v1262_v47 = vpop.f32.mrf.mxu0 }
 0x35c   :  { %v1492_v15 = vpop.f32.mrf.mxu1 }
 0x35d   :  { %v1517_v50 = vpop.f32.mrf.mxu0 }
 0x35e   :  { %v1086_v48 = vpop.f32.mrf.mxu1 }
 0x35f   :  { %v1265_v4 = vpop.f32.mrf.mxu0 }
 0x360   :  { %v1493_v20 = vpop.f32.mrf.mxu1 }
 0x362   :  { %v1089_v34 = vpop.f32.mrf.mxu1 }
 0x364   :  { %v1500_v21 = vpop.f32.mrf.mxu1 }
 0x365   :  { %v1168_v23 = vadd.f32 %v1500_v21, %v1488_v6 }
 0x366   :  { %v1159_v43 = vpop.f32.mrf.mxu1 }
 0x367   :  { %v1279_v26 = vadd.f32 %v1512_v11, %v1168_v23  ;;  %v1160_v49 = vadd.f32 %v1159_v43, %v1070_v59 }
 0x368   :  { %v1501_v54 = vpop.f32.mrf.mxu1 }
 0x369   :  { %v1294_v40 = vmul.f32 %v1399_v1, %v1279_v26  ;;  %v1277_v33 = vadd.f32 %v1246_v61, %v1160_v49  ;;  %v1171_v56 = vadd.f32 %v1501_v54, %v1489_v7 }
 0x36a   :  { %v1162_v31 = vpop.f32.mrf.mxu1 }
 0x36b   :  { %v1309_v38 = vadd.f32 %v1400_v35, %v1294_v40  ;;  %v1292_v44 = vmul.f32 %v1399_v1, %v1277_v33  ;;  %v1280_v32 = vadd.f32 %v1513_v27, %v1171_v56  ;;  %v1163_v24 = vadd.f32 %v1162_v31, %v1073_v53 }
 0x36c   :  { %v1504_v42 = vpop.f32.mrf.mxu1 }
 0x36d   :  { %v1317_v3 = vmax.f32 %v1309_v38, 0.0  ;;  %v1307_v30 = vadd.f32 %v1400_v35, %v1292_v44  ;;  %v1295_v37 = vmul.f32 %v1399_v1, %v1280_v32  ;;  %v1278_v0 = vadd.f32 %v1249_v10, %v1163_v24 }
 0x36e   :  { %v1184_v45 = vadd.f32 %v1504_v42, %v1492_v15  ;;  %v1175_v14 = vpop.f32.mrf.mxu1 }
 0x36f   :  { %1325 = vst [vmem:[#allocation5 + $0x10] sm:$0xff] %v1317_v3  ;;  %v1315_v18 = vmax.f32 %v1307_v30, 0.0  ;;  %v1310_v28 = vadd.f32 %v1400_v35, %v1295_v37  ;;  %v1293_v19 = vmul.f32 %v1399_v1, %v1278_v0  ;;  %v1176_v46 = vadd.f32 %v1175_v14, %v1086_v48 }
 0x370   :  { %v1283_v52 = vadd.f32 %v1516_v29, %v1184_v45  ;;  %v1505_v8 = vpop.f32.mrf.mxu1 }
 0x371   :  { %1323 = vst [vmem:[#allocation5] sm:$0xff] %v1315_v18  ;;  %v1318_v62 = vmax.f32 %v1310_v28, 0.0  ;;  %v1308_v55 = vadd.f32 %v1400_v35, %v1293_v19  ;;  %v1281_v58 = vadd.f32 %v1262_v47, %v1176_v46  ;;  %v1187_v17 = vadd.f32 %v1505_v8, %v1493_v20 }
 0x372   :  { %v1298_v25 = vmul.f32 %v1399_v1, %v1283_v52  ;;  %v1178_v41 = vpop.f32.mrf.mxu1 }
 0x373   :  { %1326 = vst [vmem:[#allocation5 + $0x18] sm:$0xff] %v1318_v62  ;;  %v1316_v63 = vmax.f32 %v1308_v55, 0.0  ;;  %v1296_v13 = vmul.f32 %v1399_v1, %v1281_v58  ;;  %v1284_v9 = vadd.f32 %v1517_v50, %v1187_v17  ;;  %v1179_v12 = vadd.f32 %v1178_v41, %v1089_v34 }
 0x374   :  { %v1313_v39 = vadd.f32 %v1400_v35, %v1298_v25 }
 0x375   :  { %1324 = vst [vmem:[#allocation5 + $0x8] sm:$0xff] %v1316_v63  ;;  %v1311_v2 = vadd.f32 %v1400_v35, %v1296_v13  ;;  %v1299_v36 = vmul.f32 %v1399_v1, %v1284_v9  ;;  %v1282_v51 = vadd.f32 %v1265_v4, %v1179_v12 }
 0x376   :  { %v1321_v60 = vmax.f32 %v1313_v39, 0.0 }
 0x377   :  { %v1319_v16 = vmax.f32 %v1311_v2, 0.0  ;;  %v1314_v5 = vadd.f32 %v1400_v35, %v1299_v36  ;;  %v1297_v57 = vmul.f32 %v1399_v1, %v1282_v51 }
 0x378   :  { %1329 = vst [vmem:[#allocation5 + $0x30] sm:$0xff] %v1321_v60 }
 0x379   :  { %1327 = vst [vmem:[#allocation5 + $0x20] sm:$0xff] %v1319_v16  ;;  %v1322_v22 = vmax.f32 %v1314_v5, 0.0  ;;  %v1312_v6 = vadd.f32 %v1400_v35, %v1297_v57 }
 0x37b   :  { %1330 = vst [vmem:[#allocation5 + $0x38] sm:$0xff] %v1322_v22  ;;  %v1320_v59 = vmax.f32 %v1312_v6, 0.0 }
 0x37d   :  { %1328 = vst [vmem:[#allocation5 + $0x28] sm:$0xff] %v1320_v59 }
 0x37e   :  { %1746 = shalt.err (!%p1743_p9)
}
 0x37f   :  { %1342 = dma.vmem_to_hbm [thread:$0]  %s1337_s6, 1024, %s2386_s7, [#allocation4], %s1760_s27, %s1760_s27, %s1761_s28  }
 0x380   :  { %1757 = dma.done.wait [#allocation4], 1024  }
 0x381   :  { %1758 = vsyncadd [#allocation4], 4294966272 }
 0x382   :  { %1346 = vsyncpa [#allocation3], 1 }
 0x383   :  { %1347 = vsyncpa [#allocation4], 1 }

</bundles_post_ra>
